<compile_context>
chip_gen: v5e
topology: v5e:2x2
jax: 0.10.0
libtpu: 0.0.40
codegen_flags: <defaults>
</compile_context>

<pallas_src>
import functools

import jax
import jax.numpy as jnp
from jax.experimental import pallas as pl
from jax.experimental.pallas import tpu as pltpu


def _bert_self_output_kernel(x_ref, res_ref, wt_ref, b_ref, g_ref, beta_ref,
                             o_ref, *, eps):
    # x_ref:    (tm, H)  hidden_states tile (native dtype, e.g. bf16)
    # res_ref:  (tm, H)  input_tensor (residual) tile
    # wt_ref:   (H, H)   dense weight pre-transposed to [in_features, out_features]
    # b_ref:    (1, H)   dense bias   (f32)
    # g_ref:    (1, H)   LN gamma     (f32)
    # beta_ref: (1, H)   LN beta      (f32)

    # Dense: y = x @ W^T.  W^T was materialized once in the wrapper, so this is
    # a plain contract-inner matmul on the MXU with an f32 accumulator and no
    # per-step weight transpose.
    y = jnp.dot(x_ref[...], wt_ref[...], preferred_element_type=jnp.float32)
    y = y + b_ref[...]

    # TODO(synk): dropout is identity in eval mode; no RNG applied here.

    # Residual add in f32.
    z = y + res_ref[...].astype(jnp.float32)

    # LayerNorm over the last dim — two-pass (subtract mean, then square) for
    # parity with torch.nn.LayerNorm; reductions hide under the tile DMA.
    inv_h = jnp.float32(1.0 / z.shape[-1])
    mean = jnp.sum(z, axis=-1, keepdims=True) * inv_h
    zc = z - mean
    var = jnp.sum(zc * zc, axis=-1, keepdims=True) * inv_h
    out = zc * jax.lax.rsqrt(var + eps) * g_ref[...] + beta_ref[...]

    o_ref[...] = out.astype(o_ref.dtype)


def _round_up(x, m):
    return (x + m - 1) // m * m


def _vmem_capacity_bytes():
    """Physical VMEM per TensorCore; conservative fallback if query fails."""
    try:
        return int(pltpu.get_tpu_info().vmem_capacity_bytes)
    except Exception:
        return 64 << 20  # size for the smallest current part (v7x per-TC)


def bert_self_output(hidden_states, input_tensor, w, b, gamma, beta,
                     *, eps=1e-12, tm=None):
    """hidden_states, input_tensor: [B, S, H]; w: [H, H] (PyTorch layout,
    rows = out features); b, gamma, beta: [H]."""
    B, S, H = hidden_states.shape
    M = B * S

    vmem_cap = _vmem_capacity_bytes()
    big_vmem = vmem_cap >= (96 << 20)   # v5e/v6e: 128 MiB; v7x: 64 MiB

    # Large, MXU/pipeline-friendly row tile; generation-aware default.
    if tm is None:
        tm = 1024 if big_vmem else 512
    tm = min(tm, _round_up(M, 8))
    tm = _round_up(tm, 8)
    # Keep >= 4 grid steps when the problem allows it (v7x megacore sharding +
    # prefetch slack); never shrink below 128 rows (per-step overhead amort.).
    while tm > 128 and pl.cdiv(M, tm) < 4:
        tm = _round_up(tm // 2, 8)

    n_steps = pl.cdiv(M, tm)

    x2 = hidden_states.reshape(M, H)
    r2 = input_tensor.reshape(M, H)
    # One-time transpose of the PyTorch [out, in] weight to [in, out]; a ~1 us
    # HBM pass (constant-folded under jit for static weights), avoiding any
    # per-grid-step transpose inside the kernel.
    wt = jnp.swapaxes(w, 0, 1)
    b2 = b.astype(jnp.float32).reshape(1, H)
    g2 = gamma.astype(jnp.float32).reshape(1, H)
    be2 = beta.astype(jnp.float32).reshape(1, H)

    act_bytes = jnp.dtype(hidden_states.dtype).itemsize
    w_bytes = jnp.dtype(w.dtype).itemsize
    # VMEM budget: double-buffered x/res/out tiles, double-buffered weight
    # (constant index map, but default pipelining still allocates 2x), f32
    # params, f32 matmul result + LayerNorm temporaries, plus headroom.
    vmem_bytes = (2 * 3 * tm * H * act_bytes
                  + 2 * H * H * w_bytes
                  + 2 * 3 * H * 4
                  + 4 * tm * H * 4
                  + (4 << 20))
    vmem_limit = (64 << 20) if big_vmem else (48 << 20)
    vmem_bytes = int(min(max(vmem_bytes, 16 << 20), vmem_limit))

    rows = n_steps * tm  # rows actually pushed through the MXU (ragged tail incl.)
    cost = pl.CostEstimate(
        flops=2 * rows * H * H,
        transcendentals=0,
        bytes_accessed=3 * M * H * act_bytes + H * H * w_bytes + 3 * H * 4,
    )

    kernel = functools.partial(_bert_self_output_kernel, eps=eps)

    out = pl.pallas_call(
        kernel,
        out_shape=jax.ShapeDtypeStruct((M, H), hidden_states.dtype),
        grid_spec=pltpu.PrefetchScalarGridSpec(
            num_scalar_prefetch=0,
            grid=(n_steps,),
            in_specs=[
                pl.BlockSpec((tm, H), lambda i: (i, 0)),   # hidden_states
                pl.BlockSpec((tm, H), lambda i: (i, 0)),   # input_tensor
                pl.BlockSpec((H, H), lambda i: (0, 0)),    # weight^T (constant)
                pl.BlockSpec((1, H), lambda i: (0, 0)),    # bias (f32)
                pl.BlockSpec((1, H), lambda i: (0, 0)),    # gamma (f32)
                pl.BlockSpec((1, H), lambda i: (0, 0)),    # beta (f32)
            ],
            out_specs=pl.BlockSpec((tm, H), lambda i: (i, 0)),
        ),
        compiler_params=pltpu.CompilerParams(
            dimension_semantics=("parallel",),
            vmem_limit_bytes=vmem_bytes),
        cost_estimate=cost,
    )(x2, r2, wt, b2, g2, be2)

    return out.reshape(B, S, H)


def _reference(hidden_states, input_tensor, w, b, gamma, beta, eps=1e-12):
    x = hidden_states.astype(jnp.float32)
    r = input_tensor.astype(jnp.float32)
    y = jnp.einsum("bsh,oh->bso", x, w.astype(jnp.float32)) \
        + b.astype(jnp.float32)
    z = y + r
    mean = jnp.mean(z, axis=-1, keepdims=True)
    var = jnp.mean(jnp.square(z - mean), axis=-1, keepdims=True)
    return ((z - mean) * jax.lax.rsqrt(var + eps) * gamma.astype(jnp.float32)
            + beta.astype(jnp.float32))


if __name__ == "__main__":
    # --- Test 1: small f32 sanity check (matches the module's shapes) ---
    B, S, H = 2, 8, 32
    k1, k2, k3, k4 = jax.random.split(jax.random.PRNGKey(0), 4)
    hs = jax.random.normal(k1, (B, S, H), jnp.float32)
    res = jax.random.normal(k2, (B, S, H), jnp.float32)
    w = jax.random.normal(k3, (H, H), jnp.float32) * 0.05
    b = jax.random.normal(k4, (H,), jnp.float32) * 0.01
    gamma = jnp.ones((H,), jnp.float32)
    beta = jnp.zeros((H,), jnp.float32)

    out = jax.block_until_ready(bert_self_output(hs, res, w, b, gamma, beta))
    ref = _reference(hs, res, w, b, gamma, beta)
    assert jnp.allclose(out, ref, atol=1e-5, rtol=1e-5), "f32 mismatch"

    # --- Test 2: BERT-sized bf16 run (exercises the 768-lane layout, real MXU
    #     tiles, and the ragged last grid block: M = 400, tm not dividing M) ---
    B2, S2, H2 = 2, 200, 768
    k5, k6, k7, k8 = jax.random.split(jax.random.PRNGKey(1), 4)
    hs2 = jax.random.normal(k5, (B2, S2, H2), jnp.float32).astype(jnp.bfloat16)
    res2 = jax.random.normal(k6, (B2, S2, H2), jnp.float32).astype(jnp.bfloat16)
    w2 = (jax.random.normal(k7, (H2, H2), jnp.float32) * 0.02).astype(jnp.bfloat16)
    b2 = (jax.random.normal(k8, (H2,), jnp.float32) * 0.01).astype(jnp.bfloat16)
    g2 = jnp.ones((H2,), jnp.bfloat16)
    be2 = jnp.zeros((H2,), jnp.bfloat16)

    out2 = jax.block_until_ready(bert_self_output(hs2, res2, w2, b2, g2, be2))
    ref2 = _reference(hs2, res2, w2, b2, g2, be2)
    err = jnp.max(jnp.abs(out2.astype(jnp.float32) - ref2))
    assert err < 5e-2, f"bf16 mismatch: max abs err {err}"

    print("KERNEL_OK")
</pallas_src>

<mosaic_0001>
module attributes {stable_mosaic.version = 11 : i64} {
  func.func @_bert_self_output_kernel(%arg0: i32, %arg1: memref<16x32xf32, #tpu.memory_space<vmem>>, %arg2: memref<16x32xf32, #tpu.memory_space<vmem>>, %arg3: memref<32x32xf32, #tpu.memory_space<vmem>>, %arg4: memref<1x32xf32, #tpu.memory_space<vmem>>, %arg5: memref<1x32xf32, #tpu.memory_space<vmem>>, %arg6: memref<1x32xf32, #tpu.memory_space<vmem>>, %arg7: memref<16x32xf32, #tpu.memory_space<vmem>>) attributes {dimension_semantics = [#tpu.dimension_semantics<parallel>], iteration_bounds = array<i64: 1>, scalar_prefetch = 0 : i64, scratch_operands = 0 : i64, tpu.core_type = #tpu.core_type<tc>, window_params = [{transform_indices = @transform_0, window_bounds = array<i64: 16, 32>}, {transform_indices = @transform_1, window_bounds = array<i64: 16, 32>}, {pipeline_mode = #tpu.pipeline_mode<synchronous>, transform_indices = @transform_2, window_bounds = array<i64: 32, 32>}, {pipeline_mode = #tpu.pipeline_mode<synchronous>, transform_indices = @transform_3, window_bounds = array<i64: 1, 32>}, {pipeline_mode = #tpu.pipeline_mode<synchronous>, transform_indices = @transform_4, window_bounds = array<i64: 1, 32>}, {pipeline_mode = #tpu.pipeline_mode<synchronous>, transform_indices = @transform_5, window_bounds = array<i64: 1, 32>}, {transform_indices = @transform_6, window_bounds = array<i64: 16, 32>}]} {
    %c0 = arith.constant 0 : index
    %c0_0 = arith.constant 0 : index
    %0 = vector.load %arg1[%c0, %c0_0] : memref<16x32xf32, #tpu.memory_space<vmem>>, vector<16x32xf32>
    %c0_1 = arith.constant 0 : index
    %c0_2 = arith.constant 0 : index
    %1 = vector.load %arg3[%c0_1, %c0_2] : memref<32x32xf32, #tpu.memory_space<vmem>>, vector<32x32xf32>
    %cst = arith.constant dense<0.000000e+00> : vector<16x32xf32>
    %2 = tpu.matmul %0, %1, %cst {dimension_numbers = #tpu.dot_dimension_numbers<[1], [0], [0], [1], [0, 0, 1, 1], [], []>} : vector<16x32xf32>, vector<32x32xf32>, vector<16x32xf32> -> vector<16x32xf32>
    %c0_3 = arith.constant 0 : index
    %c0_4 = arith.constant 0 : index
    %3 = vector.load %arg4[%c0_3, %c0_4] : memref<1x32xf32, #tpu.memory_space<vmem>>, vector<1x32xf32>
    %4 = vector.broadcast %3 : vector<1x32xf32> to vector<16x32xf32>
    %5 = arith.addf %2, %4 : vector<16x32xf32>
    %c0_5 = arith.constant 0 : index
    %c0_6 = arith.constant 0 : index
    %6 = vector.load %arg2[%c0_5, %c0_6] : memref<16x32xf32, #tpu.memory_space<vmem>>, vector<16x32xf32>
    %7 = arith.addf %5, %6 : vector<16x32xf32>
    %cst_7 = arith.constant dense<0.000000e+00> : vector<16xf32>
    %8 = vector.multi_reduction <add>, %7, %cst_7 [1] : vector<16x32xf32> to vector<16xf32>
    %9 = vector.shape_cast %8 : vector<16xf32> to vector<16x1xf32>
    %cst_8 = arith.constant 3.125000e-02 : f32
    %10 = vector.broadcast %cst_8 : f32 to vector<16x1xf32>
    %11 = arith.mulf %9, %10 : vector<16x1xf32>
    %12 = vector.broadcast %11 : vector<16x1xf32> to vector<16x32xf32>
    %13 = arith.subf %7, %12 : vector<16x32xf32>
    %14 = arith.mulf %13, %13 : vector<16x32xf32>
    %cst_9 = arith.constant dense<0.000000e+00> : vector<16xf32>
    %15 = vector.multi_reduction <add>, %14, %cst_9 [1] : vector<16x32xf32> to vector<16xf32>
    %16 = vector.shape_cast %15 : vector<16xf32> to vector<16x1xf32>
    %cst_10 = arith.constant 3.125000e-02 : f32
    %17 = vector.broadcast %cst_10 : f32 to vector<16x1xf32>
    %18 = arith.mulf %16, %17 : vector<16x1xf32>
    %cst_11 = arith.constant 9.99999996E-13 : f32
    %19 = vector.broadcast %cst_11 : f32 to vector<16x1xf32>
    %20 = arith.addf %18, %19 : vector<16x1xf32>
    %21 = math.rsqrt %20 : vector<16x1xf32>
    %22 = vector.broadcast %21 : vector<16x1xf32> to vector<16x32xf32>
    %23 = arith.mulf %13, %22 : vector<16x32xf32>
    %c0_12 = arith.constant 0 : index
    %c0_13 = arith.constant 0 : index
    %24 = vector.load %arg5[%c0_12, %c0_13] : memref<1x32xf32, #tpu.memory_space<vmem>>, vector<1x32xf32>
    %25 = vector.broadcast %24 : vector<1x32xf32> to vector<16x32xf32>
    %26 = arith.mulf %23, %25 : vector<16x32xf32>
    %c0_14 = arith.constant 0 : index
    %c0_15 = arith.constant 0 : index
    %27 = vector.load %arg6[%c0_14, %c0_15] : memref<1x32xf32, #tpu.memory_space<vmem>>, vector<1x32xf32>
    %28 = vector.broadcast %27 : vector<1x32xf32> to vector<16x32xf32>
    %29 = arith.addf %26, %28 : vector<16x32xf32>
    %c0_16 = arith.constant 0 : index
    %c0_17 = arith.constant 0 : index
    %30 = vector.load %arg7[%c0_16, %c0_17] : memref<16x32xf32, #tpu.memory_space<vmem>>, vector<16x32xf32>
    tpu.vector_store %arg7[%c0_16, %c0_17], %29 {strides = array<i32>} : memref<16x32xf32, #tpu.memory_space<vmem>>, vector<16x32xf32>,
    return
  }
  func.func @transform_0(%arg0: i32) -> (i32, i32) {
    %c0_i32 = arith.constant 0 : i32
    %c0_i32_0 = arith.constant 0 : i32
    return %arg0, %c0_i32 : i32, i32
  }
  func.func @transform_1(%arg0: i32) -> (i32, i32) {
    %c0_i32 = arith.constant 0 : i32
    %c0_i32_0 = arith.constant 0 : i32
    return %arg0, %c0_i32 : i32, i32
  }
  func.func @transform_2(%arg0: i32) -> (i32, i32) {
    %c0_i32 = arith.constant 0 : i32
    %c0_i32_0 = arith.constant 0 : i32
    %c0_i32_1 = arith.constant 0 : i32
    return %c0_i32, %c0_i32_0 : i32, i32
  }
  func.func @transform_3(%arg0: i32) -> (i32, i32) {
    %c0_i32 = arith.constant 0 : i32
    %c0_i32_0 = arith.constant 0 : i32
    %c0_i32_1 = arith.constant 0 : i32
    return %c0_i32, %c0_i32_0 : i32, i32
  }
  func.func @transform_4(%arg0: i32) -> (i32, i32) {
    %c0_i32 = arith.constant 0 : i32
    %c0_i32_0 = arith.constant 0 : i32
    %c0_i32_1 = arith.constant 0 : i32
    return %c0_i32, %c0_i32_0 : i32, i32
  }
  func.func @transform_5(%arg0: i32) -> (i32, i32) {
    %c0_i32 = arith.constant 0 : i32
    %c0_i32_0 = arith.constant 0 : i32
    %c0_i32_1 = arith.constant 0 : i32
    return %c0_i32, %c0_i32_0 : i32, i32
  }
  func.func @transform_6(%arg0: i32) -> (i32, i32) {
    %c0_i32 = arith.constant 0 : i32
    %c0_i32_0 = arith.constant 0 : i32
    return %arg0, %c0_i32 : i32, i32
  }
}

</mosaic_0001>

<bundles_post_ra>
// kernel: tpu_custom_call.1
= control target key start
LH: loop header
LB: loop body
LE: loop exit
PB: predicated region body
PF: predicated region fallthrough
CT: control target
= control target key end

     0   :  { %11 = vsyncpa [#allocation3], 0  ;;  %s396_s0 = inlined_call_operand.hbm [shape: f32[16,32], index: 0, kind: input, shape index: {}]   ;;  %s397_s1 = inlined_call_operand.hbm [shape: f32[16,32], index: 1, kind: input, shape index: {}]   ;;  %s398_s2 = inlined_call_operand.hbm [shape: f32[32,32], index: 2, kind: input, shape index: {}]   ;;  %s399_s3 = inlined_call_operand.vmem [shape: f32[1,32], index: 3, kind: input, shape index: {}]   ;;  %s400_s4 = inlined_call_operand.vmem [shape: f32[1,32], index: 4, kind: input, shape index: {}]   ;;  %s401_s5 = inlined_call_operand.vmem [shape: f32[1,32], index: 5, kind: input, shape index: {}]   ;;  %s402_s6 = inlined_call_operand.hbm [shape: f32[16,32], index: 6, kind: output, shape index: {}]  }
   0x1   :  { %12 = vsyncpa [#allocation6], 0 }
   0x2   :  { %13 = vsyncpa [#allocation4], 0  ;;  %s31_s23 = sshll.u32 %s397_s1, 4  ;;  %s314_s24 = smov [#allocation5]   ;;  %s32_s23 = int_to_ptr.hbm [resolvable:$true] %s31_s23 }
   0x3   :  { %s33_s25 = sshll.u32 %s314_s24, 4  ;;  %s18_s28 = sshll.u32 %s396_s0, 4  ;;  %s34_s25 = int_to_ptr.vmem [resolvable:$true] %s33_s25  ;;  %s19_s28 = int_to_ptr.hbm [resolvable:$true] %s18_s28 }
   0x4   :  { %s315_s29 = smov 128   ;;  %s316_s30 = smov 8  }
   0x5   :  { %39 = dma.hbm_to_vmem [thread:$0]  %s32_s23, 256, %s34_s25, [#allocation6], %s315_s29, %s315_s29, %s316_s30  }
   0x6   :  { %s317_s7 = smov [#allocation2]   ;;  %s44_s1 = sshll.u32 %s398_s2, 4  ;;  %s45_s1 = int_to_ptr.hbm [resolvable:$true] %s44_s1 }
   0x7   :  { %s20_s8 = sshll.u32 %s317_s7, 4  ;;  %s318_s0 = smov [#allocation7]   ;;  %s21_s8 = int_to_ptr.vmem [resolvable:$true] %s20_s8 }
   0x8   :  { %26 = dma.hbm_to_vmem [thread:$0]  %s19_s28, 256, %s21_s8, [#allocation3], %s315_s29, %s315_s29, %s316_s30  }
   0x9   :  { %s46_s11 = sshll.u32 %s318_s0, 4  ;;  %s47_s11 = int_to_ptr.vmem [resolvable:$true] %s46_s11 }
   0xa   :  { %52 = dma.hbm_to_vmem [thread:$0]  %s45_s1, 512, %s47_s11, [#allocation6], %s315_s29, %s315_s29, %s316_s30  }
   0xb   :  { %308 = dma.done.wait [#allocation3], 256  }
   0xc   :  { %309 = vsyncadd [#allocation3], 4294967040 }
   0xd   :  { %310 = dma.done.wait [#allocation6], 768  }
   0xe   :  { %311 = vsyncadd [#allocation6], 4294966528  ;;  %v76_v0 = vld [vmem:[#allocation7 + $0x18] sm:$0xff]  ;;  %v75_v1 = vld [vmem:[#allocation7 + $0x10] sm:$0xff]  ;;  %vm81_vm0 = vcmask 261120   ;;  %s179_s19 = sshll.u32 %s402_s6, 4  ;;  %s180_s19 = int_to_ptr.hbm [resolvable:$true] %s179_s19 }
   0xf   :  { %100 = vmatpush.msra.mxu0 %v76_v0  ;;  %195 = vmatpush.msra.mxu1 %v76_v0  ;;  %v74_v2 = vld [vmem:[#allocation7 + $0x8] sm:$0xff]  ;;  %v73_v3 = vld [vmem:[#allocation7] sm:$0xff]  ;;  %v111_v8 = vld [vmem:[#allocation5] sm:$0xff] }
  0x10   :  { %v71_v4 = vld [vmem:[#allocation2] sm:$0xff]  ;;  %v72_v5 = vld [vmem:[#allocation2 + $0x8] sm:$0xff]  ;;  %v112_v13 = vld [vmem:[#allocation5 + $0x8] sm:$0xff] }
  0x11   :  { %101 = vmatpush.msra.mxu0 %v75_v1  ;;  %196 = vmatpush.msra.mxu1 %v75_v1  ;;  %v205_v6 = vld [vmem:[%s399_s3] ss:$0 sm:$0xff] }
  0x12   :  { %v206_v41 = vld [vmem:[%s400_s4] ss:$0 sm:$0xff]  ;;  %s319_s4 = smov [#allocation8]  }
  0x13   :  { %102 = vmatpush.msra.mxu0 %v74_v2  ;;  %197 = vmatpush.msra.mxu1 %v74_v2  ;;  %v207_v45 = vld [vmem:[%s401_s5] ss:$0 sm:$0xff]  ;;  %s177_s16 = sshll.u32 %s319_s4, 4  ;;  %s178_s16 = int_to_ptr.vmem [resolvable:$true] %s177_s16 }
  0x15   :  { %103 = vmatpush.msra.mxu0 %v73_v3  ;;  %198 = vmatpush.msra.mxu1 %v73_v3 }
  0x16   :  { %193 = vmatmul.msk.f32.vlgmr.msra.gmra.mxu0 %vm81_vm0, %v71_v4  ;;  %194 = vmatmul.msk.f32.vlgmr.msra.gmra.mxu1 %vm81_vm0, %v72_v5 }
  0x93   :  { %v105_v7 = vpop.f32.mrf.mxu0  ;;  %v108_v9 = vpop.f32.mrf.mxu1 }
  0x94   :  { %v106_v10 = vadd.f32 %v205_v6, %v105_v7  ;;  %v109_v12 = vadd.f32 %v205_v6, %v108_v9 }
  0x96   :  { %v113_v11 = vadd.f32 %v111_v8, %v106_v10  ;;  %v114_v15 = vadd.f32 %v112_v13, %v109_v12 }
  0x98   :  { %v115_v14 = vsel %vm81_vm0, %v113_v11, 0.0  ;;  %v118_v16 = vsel %vm81_vm0, %v114_v15, 0.0 }
  0x99   :  { %116 = vadd.xlane.f32.xlu0 %v115_v14 }
  0xa1   :  { %119 = vadd.xlane.f32.xlu0 %v118_v16 }
 0x10c   :  { %v117_v17 = vpop.xlane.xlu0 %116 }
 0x10d   :  { %v121_v18 = vmul.f32 0.03125, %v117_v17 }
 0x10f   :  { %v123_v19 = vsub.f32 %v113_v11, %v121_v18 }
 0x111   :  { %v125_v20 = vmul.f32 %v123_v19, %v123_v19 }
 0x113   :  { %v127_v21 = vsel %vm81_vm0, %v125_v20, 0.0 }
 0x114   :  { %128 = vadd.xlane.f32.xlu1 %v127_v21  ;;  %v120_v22 = vpop.xlane.xlu0 %119 }
 0x115   :  { %v122_v23 = vmul.f32 0.03125, %v120_v22 }
 0x117   :  { %v124_v24 = vsub.f32 %v114_v15, %v122_v23 }
 0x119   :  { %v126_v25 = vmul.f32 %v124_v24, %v124_v24 }
 0x11b   :  { %v130_v26 = vsel %vm81_vm0, %v126_v25, 0.0 }
 0x11c   :  { %131 = vadd.xlane.f32.xlu1 %v130_v26 }
 0x187   :  { %v129_v27 = vpop.xlane.xlu1 %128 }
 0x188   :  { %v133_v28 = vmul.f32 0.03125, %v129_v27 }
 0x18a   :  { %v135_v29 = vadd.f32 1e-12, %v133_v28 }
 0x18c   :  { %208 = vrsqrt.f32 %v135_v29  ;;  %vm143_vm2 = vweird.f32 %v135_v29 }
 0x18f   :  { %v132_v30 = vpop.xlane.xlu1 %131 }
 0x190   :  { %v134_v31 = vmul.f32 0.03125, %v132_v30 }
 0x192   :  { %v209_v32 = vpop.eup %208  ;;  %v136_v33 = vadd.f32 1e-12, %v134_v31 }
 0x193   :  { %v138_v34 = vmul.f32 %v209_v32, %v135_v29  ;;  %vm144_vm1 = vweird.f32 %v209_v32 }
 0x194   :  { %210 = vrsqrt.f32 %v136_v33  ;;  %vm145_vm3 = vmor %vm143_vm2, %vm144_vm1  ;;  %vm153_vm5 = vweird.f32 %v136_v33 }
 0x195   :  { %v139_v35 = vmul.f32 %v209_v32, %v138_v34 }
 0x197   :  { %v140_v36 = vmul.f32 0.5, %v139_v35 }
 0x199   :  { %v141_v37 = vsub.f32 1.5, %v140_v36 }
 0x19a   :  { %v211_v38 = vpop.eup %210 }
 0x19b   :  { %v142_v39 = vmul.f32 %v209_v32, %v141_v37  ;;  %v148_v40 = vmul.f32 %v211_v38, %v136_v33  ;;  %vm154_vm4 = vweird.f32 %v211_v38 }
 0x19c   :  { %vm155_vm6 = vmor %vm153_vm5, %vm154_vm4 }
 0x19d   :  { %v146_v42 = vsel %vm145_vm3, %v209_v32, %v142_v39  ;;  %v149_v43 = vmul.f32 %v211_v38, %v148_v40 }
 0x19e   :  { %v157_v44 = vmul.f32 %v146_v42, %v123_v19 }
 0x19f   :  { %v150_v46 = vmul.f32 0.5, %v149_v43 }
 0x1a0   :  { %v163_v47 = vmul.f32 %v206_v41, %v157_v44 }
 0x1a1   :  { %v151_v48 = vsub.f32 1.5, %v150_v46 }
 0x1a2   :  { %v169_v49 = vadd.f32 %v207_v45, %v163_v47 }
 0x1a3   :  { %v152_v50 = vmul.f32 %v211_v38, %v151_v48 }
 0x1a4   :  { %171 = vst.msk [vmem:[#allocation8] sm:$0xff] %vm81_vm0, %v169_v49 }
 0x1a5   :  { %v156_v51 = vsel %vm155_vm6, %v211_v38, %v152_v50 }
 0x1a6   :  { %v158_v52 = vmul.f32 %v156_v51, %v124_v24 }
 0x1a8   :  { %v164_v53 = vmul.f32 %v206_v41, %v158_v52 }
 0x1aa   :  { %v170_v54 = vadd.f32 %v207_v45, %v164_v53 }
 0x1ac   :  { %172 = vst.msk [vmem:[#allocation8 + $0x8] sm:$0xff] %vm81_vm0, %v170_v54 }
 0x1ad   :  { %185 = dma.vmem_to_hbm [thread:$0]  %s178_s16, 256, %s180_s19, [#allocation4], %s315_s29, %s315_s29, %s316_s30  }
 0x1ae   :  { %312 = dma.done.wait [#allocation4], 256  }
 0x1af   :  { %313 = vsyncadd [#allocation4], 4294967040 }
 0x1b0   :  { %190 = vsyncpa [#allocation3], 1 }
 0x1b1   :  { %191 = vsyncpa [#allocation6], 1 }
 0x1b2   :  { %192 = vsyncpa [#allocation4], 1 }

</bundles_post_ra>
